<compile_context>
chip_gen: v7x
topology: tpu7x:2x2x1
jax: 0.10.0
libtpu: 0.0.40
codegen_flags: <defaults>
</compile_context>

<pallas_src>
import functools

import jax
import jax.numpy as jnp
from jax import lax
from jax.experimental import pallas as pl
from jax.experimental.pallas import tpu as pltpu

LN_LAMBDA = 2.0
KH = KW = 3
PAD = 1                      # SAME padding for a 3x3, stride-1 conv
NUM_SQUARINGS = 6            # H ~ G^(2^6): >= 64 power-iteration equivalents


def _round_up(a, m):
    return (a + m - 1) // m * m


# ----------------------------------------------------------------------------
# Fused kernel: spectral inv_scale + im2col 3x3 conv + bias, one grid step
# per batch element.
#
#   x_ref : VMEM (1, Cin, Lin)      zero/width-padded, flattened image
#   w_ref : VMEM (Cout, 9*Cin)      tap-major weight tile (spectral + matmul LHS)
#   b_ref : VMEM (Cout, 1)          bias
#   o_ref : VMEM (1, Cout, H*Wp)    lane-dense output slab for this batch
#   col_ref: VMEM scratch (9*Cin, H*Wp)   im2col slab
# ----------------------------------------------------------------------------
def _wn_conv_kernel(x_ref, w_ref, b_ref, o_ref, col_ref, *, wp):
    w = w_ref[...].astype(jnp.float32)                       # (Cout, 36)

    # ---- spectral scale: lambda_max(G) = sigma_max(W)^2, G = W W^T (8x8) ----
    g = lax.dot_general(w, w, (((1,), (1,)), ((), ())),
                        preferred_element_type=jnp.float32)  # (Cout, Cout)

    def _square(_, h):
        # Normalize by max|h| before squaring -> no f32 overflow, short chain.
        m = jnp.maximum(jnp.max(jnp.abs(h)), 1e-30)
        hn = h * (1.0 / m)
        return lax.dot_general(hn, hn, (((1,), (0,)), ((), ())),
                               preferred_element_type=jnp.float32)

    h = lax.fori_loop(0, NUM_SQUARINGS, _square, g, unroll=True)  # ~ G^64

    # Column-wise Rayleigh quotient of G with the columns of H, take the max.
    # Every quotient is a lower bound of lambda_max; the dominant column of
    # G^64 cannot be orthogonal to the top eigenvector, so this is robust.
    gh = lax.dot_general(g, h, (((1,), (0,)), ((), ())),
                         preferred_element_type=jnp.float32)       # (Cout, Cout)
    numer = jnp.sum(h * gh, axis=0, keepdims=True)                  # (1, Cout)
    denom = jnp.maximum(jnp.sum(h * h, axis=0, keepdims=True), 1e-30)
    lam = jnp.max(numer / denom)
    sigma = jnp.sqrt(jnp.maximum(lam, 0.0))
    scale = jnp.maximum(jnp.float32(1.0), sigma / jnp.float32(LN_LAMBDA))
    inv_scale = 1.0 / scale                 # exact reciprocal (accuracy path)

    # Scale the tiny weight tile once (one vreg mul) instead of the (8, hwp)
    # accumulator in the epilogue.
    ws = w * inv_scale                                        # (Cout, 36)

    # ---- im2col slab: 9 lane-shifted slices, each produced exactly once ----
    cin = x_ref.shape[1]
    hwp = o_ref.shape[2]
    for kh in range(KH):
        for kw in range(KW):
            t = kh * KW + kw
            shift = kh * wp + kw
            col_ref[t * cin:(t + 1) * cin, :] = (
                x_ref[0, :, shift:shift + hwp].astype(jnp.float32))

    # ---- single fused K = 9*Cin matmul + bias epilogue (lane-dense store) ----
    acc = lax.dot_general(ws, col_ref[...], (((1,), (0,)), ((), ())),
                          preferred_element_type=jnp.float32)  # (Cout, hwp)
    o_ref[0] = (acc + b_ref[...]).astype(o_ref.dtype)


# ----------------------------------------------------------------------------
# Forward wrapper (plain-JAX glue: one cheap pad + free reshapes, no im2col
# in HBM).
# ----------------------------------------------------------------------------
@jax.jit
def weight_normalized_conv_forward(x, w_bar, bias):
    b, cin, h, w = x.shape
    cout = w_bar.shape[0]
    kdim = KH * KW * cin

    # Layout prep: pad once (left/top = SAME halo, right to a lane-friendly
    # width Wp, bottom +1 extra row so every tap's shifted slice is in-bounds),
    # then a *free* reshape to a flat spatial axis.
    wp = _round_up(w + 2 * PAD, 8)                 # 16x16 -> Wp = 24
    hwp = h * wp                                   # 384 = 3*128 (lane-dense)
    lin = (h + 2 * PAD + 1) * wp
    x_pad = jnp.pad(x, ((0, 0), (0, 0), (PAD, PAD + 1), (PAD, wp - w - PAD)))
    x_flat = x_pad.reshape(b, cin, lin)

    # Tap-major weight (Cout, 9*Cin): column permutation of view(Cout,-1), so
    # the spectral norm is identical, and it is exactly the fused matmul LHS.
    w_in = jnp.transpose(w_bar, (0, 2, 3, 1)).reshape(cout, kdim)
    bias2d = bias.reshape(cout, 1)

    kernel = functools.partial(_wn_conv_kernel, wp=wp)
    out = pl.pallas_call(
        kernel,
        out_shape=jax.ShapeDtypeStruct((b, cout, hwp), jnp.float32),
        grid=(b,),
        in_specs=[
            pl.BlockSpec((1, cin, lin), lambda i: (i, 0, 0)),   # image slab
            pl.BlockSpec((cout, kdim), lambda i: (0, 0)),       # weight (8,36)
            pl.BlockSpec((cout, 1), lambda i: (0, 0)),          # bias
        ],
        out_specs=pl.BlockSpec((1, cout, hwp), lambda i: (i, 0, 0)),
        scratch_shapes=[pltpu.VMEM((kdim, hwp), jnp.float32)],  # im2col slab
        compiler_params=pltpu.CompilerParams(
            dimension_semantics=("parallel",)),                 # v7x: 1 batch/TC
    )(x_flat, w_in, bias2d)

    # Back to NCHW: metadata-only reshape + trim of the pad columns.
    return out.reshape(b, cout, h, wp)[:, :, :, :w]


# ----------------------------------------------------------------------------
# Pure-JAX reference (exact SVD + lax conv) for correctness checking
# ----------------------------------------------------------------------------
def reference_forward(x, w_bar, bias):
    cout = w_bar.shape[0]
    w2d = w_bar.reshape(cout, -1)
    sigma = jnp.linalg.svd(w2d, compute_uv=False)[0]
    scale = jnp.maximum(1.0, sigma / LN_LAMBDA)
    wn = w_bar / scale
    y = lax.conv_general_dilated(
        x, wn, window_strides=(1, 1), padding="SAME",
        dimension_numbers=("NCHW", "OIHW", "NCHW"))
    return y + bias.reshape(1, cout, 1, 1)


if __name__ == "__main__":
    key = jax.random.PRNGKey(0)
    k1, k2, k3 = jax.random.split(key, 3)

    B, Cin, H, W = 2, 4, 16, 16
    Cout = 8

    # Shapes per the wrapped nn.Conv2d(4, 8, 3, padding=1).
    w_bar = jax.random.normal(k1, (Cout, Cin, KH, KW), jnp.float32) * 0.4
    bias = jax.random.normal(k2, (Cout,), jnp.float32) * 0.1
    x = jax.random.normal(k3, (B, Cin, H, W), jnp.float32)

    y = jax.block_until_ready(weight_normalized_conv_forward(x, w_bar, bias))
    y_ref = jax.block_until_ready(reference_forward(x, w_bar, bias))

    assert y.shape == (B, Cout, H, W)
    err = float(jnp.max(jnp.abs(y - y_ref)))
    assert jnp.allclose(y, y_ref, atol=2e-3, rtol=2e-3), err

    print("KERNEL_OK")
</pallas_src>

<mosaic_0001>
module attributes {stable_mosaic.version = 11 : i64} {
  func.func @_wn_conv_kernel(%arg0: i32, %arg1: memref<1x4x456xf32, #tpu.memory_space<vmem>>, %arg2: memref<8x36xf32, #tpu.memory_space<vmem>>, %arg3: memref<8x1xf32, #tpu.memory_space<vmem>>, %arg4: memref<1x8x384xf32, #tpu.memory_space<vmem>>, %arg5: memref<36x384xf32, #tpu.memory_space<vmem>>) attributes {dimension_semantics = [#tpu.dimension_semantics<parallel>], iteration_bounds = array<i64: 2>, scalar_prefetch = 0 : i64, scratch_operands = 1 : i64, tpu.core_type = #tpu.core_type<tc>, window_params = [{transform_indices = @transform_0, window_bounds = array<i64: 1, 4, 456>}, {pipeline_mode = #tpu.pipeline_mode<synchronous>, transform_indices = @transform_1, window_bounds = array<i64: 8, 36>}, {pipeline_mode = #tpu.pipeline_mode<synchronous>, transform_indices = @transform_2, window_bounds = array<i64: 8, 1>}, {transform_indices = @transform_3, window_bounds = array<i64: 1, 8, 384>}]} {
    %c0 = arith.constant 0 : index
    %c0_0 = arith.constant 0 : index
    %0 = vector.load %arg2[%c0, %c0_0] : memref<8x36xf32, #tpu.memory_space<vmem>>, vector<8x36xf32>
    %cst = arith.constant dense<0.000000e+00> : vector<8x8xf32>
    %1 = tpu.matmul %0, %0, %cst {dimension_numbers = #tpu.dot_dimension_numbers<[1], [1], [0], [0], [0, 0, 1, 0], [], []>} : vector<8x36xf32>, vector<8x36xf32>, vector<8x8xf32> -> vector<8x8xf32>
    %c0_i32 = arith.constant 0 : i32
    %2 = math.absf %1 : vector<8x8xf32>
    %3 = vector.shape_cast %2 : vector<8x8xf32> to vector<1x8x8xf32>
    %cst_1 = arith.constant dense<0xFF800000> : vector<1xf32>
    %4 = vector.multi_reduction <maximumf>, %3, %cst_1 [1, 2] : vector<1x8x8xf32> to vector<1xf32>
    %5 = vector.shape_cast %4 : vector<1xf32> to vector<1x1x1xf32>
    %6 = vector.extract %5[0, 0, 0] : f32 from vector<1x1x1xf32>
    %cst_2 = arith.constant 1.000000e-30 : f32
    %7 = arith.maximumf %6, %cst_2 : f32
    %cst_3 = arith.constant 1.000000e+00 : f32
    %8 = arith.divf %cst_3, %7 : f32
    %9 = vector.broadcast %8 : f32 to vector<8x8xf32>
    %10 = arith.mulf %1, %9 : vector<8x8xf32>
    %cst_4 = arith.constant dense<0.000000e+00> : vector<8x8xf32>
    %11 = tpu.matmul %10, %10, %cst_4 {dimension_numbers = #tpu.dot_dimension_numbers<[1], [0], [0], [1], [0, 0, 1, 1], [], []>} : vector<8x8xf32>, vector<8x8xf32>, vector<8x8xf32> -> vector<8x8xf32>
    %c1_i32 = arith.constant 1 : i32
    %12 = math.absf %11 : vector<8x8xf32>
    %13 = vector.shape_cast %12 : vector<8x8xf32> to vector<1x8x8xf32>
    %cst_5 = arith.constant dense<0xFF800000> : vector<1xf32>
    %14 = vector.multi_reduction <maximumf>, %13, %cst_5 [1, 2] : vector<1x8x8xf32> to vector<1xf32>
    %15 = vector.shape_cast %14 : vector<1xf32> to vector<1x1x1xf32>
    %16 = vector.extract %15[0, 0, 0] : f32 from vector<1x1x1xf32>
    %cst_6 = arith.constant 1.000000e-30 : f32
    %17 = arith.maximumf %16, %cst_6 : f32
    %cst_7 = arith.constant 1.000000e+00 : f32
    %18 = arith.divf %cst_7, %17 : f32
    %19 = vector.broadcast %18 : f32 to vector<8x8xf32>
    %20 = arith.mulf %11, %19 : vector<8x8xf32>
    %cst_8 = arith.constant dense<0.000000e+00> : vector<8x8xf32>
    %21 = tpu.matmul %20, %20, %cst_8 {dimension_numbers = #tpu.dot_dimension_numbers<[1], [0], [0], [1], [0, 0, 1, 1], [], []>} : vector<8x8xf32>, vector<8x8xf32>, vector<8x8xf32> -> vector<8x8xf32>
    %c2_i32 = arith.constant 2 : i32
    %22 = math.absf %21 : vector<8x8xf32>
    %23 = vector.shape_cast %22 : vector<8x8xf32> to vector<1x8x8xf32>
    %cst_9 = arith.constant dense<0xFF800000> : vector<1xf32>
    %24 = vector.multi_reduction <maximumf>, %23, %cst_9 [1, 2] : vector<1x8x8xf32> to vector<1xf32>
    %25 = vector.shape_cast %24 : vector<1xf32> to vector<1x1x1xf32>
    %26 = vector.extract %25[0, 0, 0] : f32 from vector<1x1x1xf32>
    %cst_10 = arith.constant 1.000000e-30 : f32
    %27 = arith.maximumf %26, %cst_10 : f32
    %cst_11 = arith.constant 1.000000e+00 : f32
    %28 = arith.divf %cst_11, %27 : f32
    %29 = vector.broadcast %28 : f32 to vector<8x8xf32>
    %30 = arith.mulf %21, %29 : vector<8x8xf32>
    %cst_12 = arith.constant dense<0.000000e+00> : vector<8x8xf32>
    %31 = tpu.matmul %30, %30, %cst_12 {dimension_numbers = #tpu.dot_dimension_numbers<[1], [0], [0], [1], [0, 0, 1, 1], [], []>} : vector<8x8xf32>, vector<8x8xf32>, vector<8x8xf32> -> vector<8x8xf32>
    %c3_i32 = arith.constant 3 : i32
    %32 = math.absf %31 : vector<8x8xf32>
    %33 = vector.shape_cast %32 : vector<8x8xf32> to vector<1x8x8xf32>
    %cst_13 = arith.constant dense<0xFF800000> : vector<1xf32>
    %34 = vector.multi_reduction <maximumf>, %33, %cst_13 [1, 2] : vector<1x8x8xf32> to vector<1xf32>
    %35 = vector.shape_cast %34 : vector<1xf32> to vector<1x1x1xf32>
    %36 = vector.extract %35[0, 0, 0] : f32 from vector<1x1x1xf32>
    %cst_14 = arith.constant 1.000000e-30 : f32
    %37 = arith.maximumf %36, %cst_14 : f32
    %cst_15 = arith.constant 1.000000e+00 : f32
    %38 = arith.divf %cst_15, %37 : f32
    %39 = vector.broadcast %38 : f32 to vector<8x8xf32>
    %40 = arith.mulf %31, %39 : vector<8x8xf32>
    %cst_16 = arith.constant dense<0.000000e+00> : vector<8x8xf32>
    %41 = tpu.matmul %40, %40, %cst_16 {dimension_numbers = #tpu.dot_dimension_numbers<[1], [0], [0], [1], [0, 0, 1, 1], [], []>} : vector<8x8xf32>, vector<8x8xf32>, vector<8x8xf32> -> vector<8x8xf32>
    %c4_i32 = arith.constant 4 : i32
    %42 = math.absf %41 : vector<8x8xf32>
    %43 = vector.shape_cast %42 : vector<8x8xf32> to vector<1x8x8xf32>
    %cst_17 = arith.constant dense<0xFF800000> : vector<1xf32>
    %44 = vector.multi_reduction <maximumf>, %43, %cst_17 [1, 2] : vector<1x8x8xf32> to vector<1xf32>
    %45 = vector.shape_cast %44 : vector<1xf32> to vector<1x1x1xf32>
    %46 = vector.extract %45[0, 0, 0] : f32 from vector<1x1x1xf32>
    %cst_18 = arith.constant 1.000000e-30 : f32
    %47 = arith.maximumf %46, %cst_18 : f32
    %cst_19 = arith.constant 1.000000e+00 : f32
    %48 = arith.divf %cst_19, %47 : f32
    %49 = vector.broadcast %48 : f32 to vector<8x8xf32>
    %50 = arith.mulf %41, %49 : vector<8x8xf32>
    %cst_20 = arith.constant dense<0.000000e+00> : vector<8x8xf32>
    %51 = tpu.matmul %50, %50, %cst_20 {dimension_numbers = #tpu.dot_dimension_numbers<[1], [0], [0], [1], [0, 0, 1, 1], [], []>} : vector<8x8xf32>, vector<8x8xf32>, vector<8x8xf32> -> vector<8x8xf32>
    %c5_i32 = arith.constant 5 : i32
    %52 = math.absf %51 : vector<8x8xf32>
    %53 = vector.shape_cast %52 : vector<8x8xf32> to vector<1x8x8xf32>
    %cst_21 = arith.constant dense<0xFF800000> : vector<1xf32>
    %54 = vector.multi_reduction <maximumf>, %53, %cst_21 [1, 2] : vector<1x8x8xf32> to vector<1xf32>
    %55 = vector.shape_cast %54 : vector<1xf32> to vector<1x1x1xf32>
    %56 = vector.extract %55[0, 0, 0] : f32 from vector<1x1x1xf32>
    %cst_22 = arith.constant 1.000000e-30 : f32
    %57 = arith.maximumf %56, %cst_22 : f32
    %cst_23 = arith.constant 1.000000e+00 : f32
    %58 = arith.divf %cst_23, %57 : f32
    %59 = vector.broadcast %58 : f32 to vector<8x8xf32>
    %60 = arith.mulf %51, %59 : vector<8x8xf32>
    %cst_24 = arith.constant dense<0.000000e+00> : vector<8x8xf32>
    %61 = tpu.matmul %60, %60, %cst_24 {dimension_numbers = #tpu.dot_dimension_numbers<[1], [0], [0], [1], [0, 0, 1, 1], [], []>} : vector<8x8xf32>, vector<8x8xf32>, vector<8x8xf32> -> vector<8x8xf32>
    %cst_25 = arith.constant dense<0.000000e+00> : vector<8x8xf32>
    %62 = tpu.matmul %1, %61, %cst_25 {dimension_numbers = #tpu.dot_dimension_numbers<[1], [0], [0], [1], [0, 0, 1, 1], [], []>} : vector<8x8xf32>, vector<8x8xf32>, vector<8x8xf32> -> vector<8x8xf32>
    %63 = arith.mulf %61, %62 : vector<8x8xf32>
    %cst_26 = arith.constant dense<0.000000e+00> : vector<8xf32>
    %64 = vector.multi_reduction <add>, %63, %cst_26 [0] : vector<8x8xf32> to vector<8xf32>
    %65 = vector.shape_cast %64 : vector<8xf32> to vector<1x8xf32>
    %66 = arith.mulf %61, %61 : vector<8x8xf32>
    %cst_27 = arith.constant dense<0.000000e+00> : vector<8xf32>
    %67 = vector.multi_reduction <add>, %66, %cst_27 [0] : vector<8x8xf32> to vector<8xf32>
    %68 = vector.shape_cast %67 : vector<8xf32> to vector<1x8xf32>
    %cst_28 = arith.constant 1.000000e-30 : f32
    %69 = vector.broadcast %cst_28 : f32 to vector<1x8xf32>
    %70 = arith.maximumf %68, %69 : vector<1x8xf32>
    %71 = arith.divf %65, %70 : vector<1x8xf32>
    %72 = vector.shape_cast %71 : vector<1x8xf32> to vector<1x1x8xf32>
    %cst_29 = arith.constant dense<0xFF800000> : vector<1xf32>
    %73 = vector.multi_reduction <maximumf>, %72, %cst_29 [1, 2] : vector<1x1x8xf32> to vector<1xf32>
    %74 = vector.shape_cast %73 : vector<1xf32> to vector<1x1x1xf32>
    %75 = vector.extract %74[0, 0, 0] : f32 from vector<1x1x1xf32>
    %cst_30 = arith.constant 0.000000e+00 : f32
    %76 = arith.maximumf %75, %cst_30 : f32
    %77 = math.sqrt %76 : f32
    %cst_31 = arith.constant 2.000000e+00 : f32
    %78 = arith.divf %77, %cst_31 : f32
    %cst_32 = arith.constant 1.000000e+00 : f32
    %79 = arith.maximumf %cst_32, %78 : f32
    %cst_33 = arith.constant 1.000000e+00 : f32
    %80 = arith.divf %cst_33, %79 : f32
    %81 = vector.broadcast %80 : f32 to vector<8x36xf32>
    %82 = arith.mulf %0, %81 : vector<8x36xf32>
    %c0_34 = arith.constant 0 : index
    %c0_35 = arith.constant 0 : index
    %c0_36 = arith.constant 0 : index
    %83 = vector.load %arg1[%c0_34, %c0_35, %c0_36] : memref<1x4x456xf32, #tpu.memory_space<vmem>>, vector<1x4x384xf32>
    %84 = vector.shape_cast %83 : vector<1x4x384xf32> to vector<4x384xf32>
    %c0_37 = arith.constant 0 : index
    %c0_38 = arith.constant 0 : index
    %85 = vector.load %arg5[%c0_37, %c0_38] : memref<36x384xf32, #tpu.memory_space<vmem>>, vector<4x384xf32>
    tpu.vector_store %arg5[%c0_37, %c0_38], %84 {strides = array<i32>} : memref<36x384xf32, #tpu.memory_space<vmem>>, vector<4x384xf32>,
    %c0_39 = arith.constant 0 : index
    %c0_40 = arith.constant 0 : index
    %c1 = arith.constant 1 : index
    %86 = vector.load %arg1[%c0_39, %c0_40, %c1] : memref<1x4x456xf32, #tpu.memory_space<vmem>>, vector<1x4x384xf32>
    %87 = vector.shape_cast %86 : vector<1x4x384xf32> to vector<4x384xf32>
    %c4 = arith.constant 4 : index
    %c0_41 = arith.constant 0 : index
    %88 = vector.load %arg5[%c4, %c0_41] : memref<36x384xf32, #tpu.memory_space<vmem>>, vector<4x384xf32>
    tpu.vector_store %arg5[%c4, %c0_41], %87 {strides = array<i32>} : memref<36x384xf32, #tpu.memory_space<vmem>>, vector<4x384xf32>,
    %c0_42 = arith.constant 0 : index
    %c0_43 = arith.constant 0 : index
    %c2 = arith.constant 2 : index
    %89 = vector.load %arg1[%c0_42, %c0_43, %c2] : memref<1x4x456xf32, #tpu.memory_space<vmem>>, vector<1x4x384xf32>
    %90 = vector.shape_cast %89 : vector<1x4x384xf32> to vector<4x384xf32>
    %c8 = arith.constant 8 : index
    %c0_44 = arith.constant 0 : index
    %91 = vector.load %arg5[%c8, %c0_44] : memref<36x384xf32, #tpu.memory_space<vmem>>, vector<4x384xf32>
    tpu.vector_store %arg5[%c8, %c0_44], %90 {strides = array<i32>} : memref<36x384xf32, #tpu.memory_space<vmem>>, vector<4x384xf32>,
    %c0_45 = arith.constant 0 : index
    %c0_46 = arith.constant 0 : index
    %c24 = arith.constant 24 : index
    %92 = vector.load %arg1[%c0_45, %c0_46, %c24] : memref<1x4x456xf32, #tpu.memory_space<vmem>>, vector<1x4x384xf32>
    %93 = vector.shape_cast %92 : vector<1x4x384xf32> to vector<4x384xf32>
    %c12 = arith.constant 12 : index
    %c0_47 = arith.constant 0 : index
    %94 = vector.load %arg5[%c12, %c0_47] : memref<36x384xf32, #tpu.memory_space<vmem>>, vector<4x384xf32>
    tpu.vector_store %arg5[%c12, %c0_47], %93 {strides = array<i32>} : memref<36x384xf32, #tpu.memory_space<vmem>>, vector<4x384xf32>,
    %c0_48 = arith.constant 0 : index
    %c0_49 = arith.constant 0 : index
    %c25 = arith.constant 25 : index
    %95 = vector.load %arg1[%c0_48, %c0_49, %c25] : memref<1x4x456xf32, #tpu.memory_space<vmem>>, vector<1x4x384xf32>
    %96 = vector.shape_cast %95 : vector<1x4x384xf32> to vector<4x384xf32>
    %c16 = arith.constant 16 : index
    %c0_50 = arith.constant 0 : index
    %97 = vector.load %arg5[%c16, %c0_50] : memref<36x384xf32, #tpu.memory_space<vmem>>, vector<4x384xf32>
    tpu.vector_store %arg5[%c16, %c0_50], %96 {strides = array<i32>} : memref<36x384xf32, #tpu.memory_space<vmem>>, vector<4x384xf32>,
    %c0_51 = arith.constant 0 : index
    %c0_52 = arith.constant 0 : index
    %c26 = arith.constant 26 : index
    %98 = vector.load %arg1[%c0_51, %c0_52, %c26] : memref<1x4x456xf32, #tpu.memory_space<vmem>>, vector<1x4x384xf32>
    %99 = vector.shape_cast %98 : vector<1x4x384xf32> to vector<4x384xf32>
    %c20 = arith.constant 20 : index
    %c0_53 = arith.constant 0 : index
    %100 = vector.load %arg5[%c20, %c0_53] : memref<36x384xf32, #tpu.memory_space<vmem>>, vector<4x384xf32>
    tpu.vector_store %arg5[%c20, %c0_53], %99 {strides = array<i32>} : memref<36x384xf32, #tpu.memory_space<vmem>>, vector<4x384xf32>,
    %c0_54 = arith.constant 0 : index
    %c0_55 = arith.constant 0 : index
    %c48 = arith.constant 48 : index
    %101 = vector.load %arg1[%c0_54, %c0_55, %c48] : memref<1x4x456xf32, #tpu.memory_space<vmem>>, vector<1x4x384xf32>
    %102 = vector.shape_cast %101 : vector<1x4x384xf32> to vector<4x384xf32>
    %c24_56 = arith.constant 24 : index
    %c0_57 = arith.constant 0 : index
    %103 = vector.load %arg5[%c24_56, %c0_57] : memref<36x384xf32, #tpu.memory_space<vmem>>, vector<4x384xf32>
    tpu.vector_store %arg5[%c24_56, %c0_57], %102 {strides = array<i32>} : memref<36x384xf32, #tpu.memory_space<vmem>>, vector<4x384xf32>,
    %c0_58 = arith.constant 0 : index
    %c0_59 = arith.constant 0 : index
    %c49 = arith.constant 49 : index
    %104 = vector.load %arg1[%c0_58, %c0_59, %c49] : memref<1x4x456xf32, #tpu.memory_space<vmem>>, vector<1x4x384xf32>
    %105 = vector.shape_cast %104 : vector<1x4x384xf32> to vector<4x384xf32>
    %c28 = arith.constant 28 : index
    %c0_60 = arith.constant 0 : index
    %106 = vector.load %arg5[%c28, %c0_60] : memref<36x384xf32, #tpu.memory_space<vmem>>, vector<4x384xf32>
    tpu.vector_store %arg5[%c28, %c0_60], %105 {strides = array<i32>} : memref<36x384xf32, #tpu.memory_space<vmem>>, vector<4x384xf32>,
    %c0_61 = arith.constant 0 : index
    %c0_62 = arith.constant 0 : index
    %c50 = arith.constant 50 : index
    %107 = vector.load %arg1[%c0_61, %c0_62, %c50] : memref<1x4x456xf32, #tpu.memory_space<vmem>>, vector<1x4x384xf32>
    %108 = vector.shape_cast %107 : vector<1x4x384xf32> to vector<4x384xf32>
    %c32 = arith.constant 32 : index
    %c0_63 = arith.constant 0 : index
    %109 = vector.load %arg5[%c32, %c0_63] : memref<36x384xf32, #tpu.memory_space<vmem>>, vector<4x384xf32>
    tpu.vector_store %arg5[%c32, %c0_63], %108 {strides = array<i32>} : memref<36x384xf32, #tpu.memory_space<vmem>>, vector<4x384xf32>,
    %c0_64 = arith.constant 0 : index
    %c0_65 = arith.constant 0 : index
    %110 = vector.load %arg5[%c0_64, %c0_65] : memref<36x384xf32, #tpu.memory_space<vmem>>, vector<36x384xf32>
    %cst_66 = arith.constant dense<0.000000e+00> : vector<8x384xf32>
    %111 = tpu.matmul %82, %110, %cst_66 {dimension_numbers = #tpu.dot_dimension_numbers<[1], [0], [0], [1], [0, 0, 1, 1], [], []>} : vector<8x36xf32>, vector<36x384xf32>, vector<8x384xf32> -> vector<8x384xf32>
    %c0_67 = arith.constant 0 : index
    %c0_68 = arith.constant 0 : index
    %112 = vector.load %arg3[%c0_67, %c0_68] : memref<8x1xf32, #tpu.memory_space<vmem>>, vector<8x1xf32>
    %113 = vector.broadcast %112 : vector<8x1xf32> to vector<8x384xf32>
    %114 = arith.addf %111, %113 : vector<8x384xf32>
    %c0_69 = arith.constant 0 : index
    %c0_70 = arith.constant 0 : index
    %c0_71 = arith.constant 0 : index
    %115 = vector.load %arg4[%c0_69, %c0_70, %c0_71] : memref<1x8x384xf32, #tpu.memory_space<vmem>>, vector<1x8x384xf32>
    %116 = vector.shape_cast %115 : vector<1x8x384xf32> to vector<8x384xf32>
    %117 = vector.shape_cast %114 : vector<8x384xf32> to vector<1x8x384xf32>
    tpu.vector_store %arg4[%c0_69, %c0_70, %c0_71], %117 {strides = array<i32>} : memref<1x8x384xf32, #tpu.memory_space<vmem>>, vector<1x8x384xf32>,
    return
  }
  func.func @transform_0(%arg0: i32) -> (i32, i32, i32) {
    %c0_i32 = arith.constant 0 : i32
    %c0_i32_0 = arith.constant 0 : i32
    %c0_i32_1 = arith.constant 0 : i32
    return %arg0, %c0_i32, %c0_i32_0 : i32, i32, i32
  }
  func.func @transform_1(%arg0: i32) -> (i32, i32) {
    %c0_i32 = arith.constant 0 : i32
    %c0_i32_0 = arith.constant 0 : i32
    %c0_i32_1 = arith.constant 0 : i32
    return %c0_i32, %c0_i32_0 : i32, i32
  }
  func.func @transform_2(%arg0: i32) -> (i32, i32) {
    %c0_i32 = arith.constant 0 : i32
    %c0_i32_0 = arith.constant 0 : i32
    %c0_i32_1 = arith.constant 0 : i32
    return %c0_i32, %c0_i32_0 : i32, i32
  }
  func.func @transform_3(%arg0: i32) -> (i32, i32, i32) {
    %c0_i32 = arith.constant 0 : i32
    %c0_i32_0 = arith.constant 0 : i32
    %c0_i32_1 = arith.constant 0 : i32
    return %arg0, %c0_i32, %c0_i32_0 : i32, i32, i32
  }
}

</mosaic_0001>

<bundles_post_ra>
// kernel: weight_normalized_conv_forward.1
= control target key start
LH: loop header
LB: loop body
LE: loop exit
PB: predicated region body
PF: predicated region fallthrough
CT: control target
= control target key end

     0   :  { %s1570_s12 = smov 0   ;;  %s1736_s0 = inlined_call_operand.vmem [shape: f32[2,4,456], index: 0, kind: input, shape index: {}]   ;;  %s1737_s1 = inlined_call_operand.vmem [shape: f32[8,36], index: 1, kind: input, shape index: {}]   ;;  %s1738_s2 = inlined_call_operand.vmem [shape: f32[8,1], index: 2, kind: input, shape index: {}]   ;;  %s1739_s3 = inlined_call_operand.vmem [shape: f32[2,8,384], index: 3, kind: output, shape index: {}]  }
   0x1 LB: > { %s1335_s13 = sadd.s32 4294967295, %s1533_s12   ;;  %p1339_p0 = scmp.ge.s32.totalorder %s1533_s12, 1  ;;  %s1533_s12 = sphi %s1570_s12, %s13_s12  }
   0x2   : > { %p137_p1 = scmp.lt.s32.totalorder %s1533_s12, 3 }
   0x4   : > { %p138_p2 = pnand %p1339_p0, %p137_p1 }
   0x5   : > { %v1581_v0 = vld [vmem:[%s1737_s1] sm:$0xff] (!%p138_p2)  ;;  %vm172_vm0 = vcmask (!%p138_p2), 293888   ;;  %v1535_v1 = vmov (!%p138_p2), 0.0   ;;  %vm1536_vm1 = vmmov (!%p138_p2), 0   ;;  %vm247_vm2 = vcmask (!%p138_p2), 64512   ;;  %p161_p3 = scmp.lt.s32.totalorder (!%p138_p2), %s1335_s13, 1 }
   0x6   : > { %141 = sbr.rel (%p138_p2) target bundleno = 3912 (0xf48), region = 32  ;;  %1382 = vmatprep.subr.mxu0 (!%p138_p2), %v1535_v1  ;;  %1384 = vmatprep.mubr.msk.f32.mxu0 (!%p138_p2), %vm1536_vm1, %v1535_v1  ;;  %s1537_s17 = smov (!%p138_p2), 1e-30   ;;  %vm948_vm3 = vcmask (!%p138_p2), 1031168   ;;  %vm924_vm4 = vcmask (!%p138_p2), 1039360   ;;  %vm972_vm5 = vcmask (!%p138_p2), 850944  }
   0x7   : > { %1383 = vmatpush3.xpose.msk.msra.mxu0 (!%p138_p2), %vm172_vm0, %v1581_v0  ;;  %1387 = vmatprep.subr.mxu1 (!%p138_p2), %v1535_v1  ;;  %s1538_s14 = smov (!%p138_p2), 127   ;;  %s1539_s15 = smov (!%p138_p2), 126   ;;  %vm996_vm6 = vcmask (!%p138_p2), 842752   ;;  %vm1044_vm7 = vcmask (!%p138_p2), 654336   ;;  %vm1020_vm8 = vcmask (!%p138_p2), 834560   ;;  %vm1068_vm9 = vcmask (!%p138_p2), 646144  }
   0x8   : > { %1389 = vmatprep.mubr.msk.f32.mxu1 (!%p138_p2), %vm1536_vm1, %v1535_v1  ;;  %1397 = vmatprep.subr.mxu0 (!%p138_p2), %v1535_v1  ;;  %vm1092_vm10 = vcmask (!%p138_p2), 637952   ;;  %vm1126_vm11 = vcmask (!%p138_p2), 1043456  }
   0xa   : > { %1385 = vmatmul.mubr.msk.f32.vlgmr.msra.gmra.mrb[0].mxu0 (!%p138_p2), %vm172_vm0, %v1581_v0 }
   0xb   : > { %1399 = vmatprep.mubr.msk.f32.mxu0 (!%p138_p2), %vm1536_vm1, %v1535_v1 }
   0xd   : > { %s1741_s13 = smov (!%p161_p3, %s1335_s13), 1 }
   0xe   : > { %s1359_s8 = sshll.u32 %s1741_s13, 4 }
   0xf   : > { %s1648_s11 = scalar_lea.vmem %s1736_s0, %s1359_s8 }
  0xdd   : > { %v1596_v2 = vpop.f32.mrb[0].mxu0 }
  0xde   : > { %v1386_v3 = vpop.f32.mrb[1].mxu0  ;;  %v246_v4 = vand.u32 2147483647, %v1596_v2 }
  0xe0   : > { %v248_v5 = vsel %vm247_vm2, %v246_v4, -inf }
  0xe1   : > { %249 = vmax.xlane.f32.xlu0 %v248_v5 }
 0x16e   : > { %v250_v6 = vpop.xlane.xlu0 %249 }
 0x16f   : > { %v251_v7 = vrot.slane %v250_v6, 4 }
 0x171   : > { %v252_v8 = vmax.f32 %v250_v6, %v251_v7 }
 0x173   : > { %v253_v9 = vrot.slane %v252_v8, 2 }
 0x175   : > { %v254_v10 = vmax.f32 %v252_v8, %v253_v9 }
 0x177   : > { %v255_v11 = vrot.slane %v254_v10, 1 }
 0x179   : > { %v256_v12 = vmax.f32 %v254_v10, %v255_v11 }
 0x17b   : > { %1450 = vpush %v256_v12 }
 0x1ac   : > { %s1451_s16 = spop %1450 }
 0x1ad   : > { %s258_s18 = smax.f32 %s1537_s17, %s1451_s16  ;;  %s1540_s16 = smov 104  }
 0x1ae   : > { %v259_v13 = vstv %s258_s18  ;;  %s1542_s18 = smov 102  }
 0x1af   : > { %1509 = vrcp.f32 %v259_v13 }
 0x1b9   : > { %v1510_v14 = vpop.eup %1509 }
 0x1ba   : > { %1452 = vpush %v1510_v14 }
 0x1eb   : > { %s1453_s19 = spop %1452 }
 0x1ec   : > { %v262_v15 = vstv %s1453_s19  ;;  %s1543_s19 = smov 80  }
 0x1ed   : > { %v263_v16 = vmul.f32 %v262_v15, %v1596_v2 }
 0x1ef   : > { %1388 = vmatpush3.msra.mxu1 %v263_v16 }
 0x1f0   : > { %1390 = vmatmul.mubr.msk.f32.vlgmr.msra.gmra.mrb[0].mxu1 %vm247_vm2, %v263_v16  ;;  %1392 = vmatprep.subr.mxu1 %v1535_v1 }
 0x1f1   : > { %1394 = vmatprep.mubr.msk.f32.mxu1 %vm1536_vm1, %v1535_v1 }
 0x2c3   : > { %v333_v17 = vpop.f32.mrb[0].mxu1 }
 0x2c4   : > { %v337_v18 = vand.u32 2147483647, %v333_v17  ;;  %v1391_v19 = vpop.f32.mrb[1].mxu1 }
 0x2c6   : > { %v338_v20 = vsel %vm247_vm2, %v337_v18, -inf }
 0x2c7   : > { %339 = vmax.xlane.f32.xlu0 %v338_v20 }
 0x354   : > { %v340_v21 = vpop.xlane.xlu0 %339 }
 0x355   : > { %v341_v22 = vrot.slane %v340_v21, 4 }
 0x357   : > { %v342_v23 = vmax.f32 %v340_v21, %v341_v22 }
 0x359   : > { %v343_v24 = vrot.slane %v342_v23, 2 }
 0x35b   : > { %v344_v25 = vmax.f32 %v342_v23, %v343_v24 }
 0x35d   : > { %v345_v26 = vrot.slane %v344_v25, 1 }
 0x35f   : > { %v346_v27 = vmax.f32 %v344_v25, %v345_v26 }
 0x361   : > { %1454 = vpush %v346_v27 }
 0x392   : > { %s1455_s20 = spop %1454 }
 0x393   : > { %s348_s21 = smax.f32 %s1537_s17, %s1455_s20  ;;  %s1544_s20 = smov 79  }
 0x394   : > { %v349_v28 = vstv %s348_s21  ;;  %s1545_s21 = smov 78  }
 0x395   : > { %1511 = vrcp.f32 %v349_v28 }
 0x39f   : > { %v1512_v29 = vpop.eup %1511 }
 0x3a0   : > { %1456 = vpush %v1512_v29 }
 0x3d1   : > { %s1457_s22 = spop %1456 }
 0x3d2   : > { %v352_v30 = vstv %s1457_s22 }
 0x3d3   : > { %v353_v31 = vmul.f32 %v352_v30, %v333_v17 }
 0x3d5   : > { %1393 = vmatpush3.msra.mxu1 %v353_v31 }
 0x3d6   : > { %1395 = vmatmul.mubr.msk.f32.vlgmr.msra.gmra.mrb[2].mxu1 %vm247_vm2, %v353_v31  ;;  %1402 = vmatprep.subr.mxu1 %v1535_v1 }
 0x3d7   : > { %1404 = vmatprep.mubr.msk.f32.mxu1 %vm1536_vm1, %v1535_v1 }
 0x4a9   : > { %v423_v32 = vpop.f32.mrb[2].mxu1 }
 0x4aa   : > { %v1396_v33 = vpop.f32.mrb[3].mxu1  ;;  %v427_v34 = vand.u32 2147483647, %v423_v32 }
 0x4ab   : > { %v1651_v33 = vld [vmem:[%s1648_s11] sm:$0xff] }
 0x4ac   : > { %v428_v35 = vsel %vm247_vm2, %v427_v34, -inf  ;;  %907 = vst [vmem:[#allocation2] sm:$0xf] %v1651_v33  ;;  %v911_v34 = vld [vmem:[%s1648_s11 + $0x8] sm:$0xff] }
 0x4ad   : > { %429 = vmax.xlane.f32.xlu1 %v428_v35  ;;  %v914_v35 = vcombine.low %v1651_v33, %v1651_v33 }
 0x53a   : > { %v430_v36 = vpop.xlane.xlu1 %429 }
 0x53b   : > { %v431_v37 = vrot.slane %v430_v36, 4 }
 0x53d   : > { %v432_v38 = vmax.f32 %v430_v36, %v431_v37  ;;  %v939_v36 = vcombine.high %v911_v34, %v911_v34 }
 0x53f   : > { %v433_v39 = vrot.slane %v432_v38, 2 }
 0x541   : > { %v434_v40 = vmax.f32 %v432_v38, %v433_v39 }
 0x543   : > { %v435_v41 = vrot.slane %v434_v40, 1 }
 0x545   : > { %v436_v42 = vmax.f32 %v434_v40, %v435_v41 }
 0x547   : > { %1458 = vpush %v436_v42 }
 0x578   : > { %s1459_s23 = spop %1458 }
 0x579   : > { %s438_s24 = smax.f32 %s1537_s17, %s1459_s23  ;;  %s1547_s23 = smov 0.0  }
 0x57a   : > { %v439_v43 = vstv %s438_s24 }
 0x57b   : > { %1513 = vrcp.f32 %v439_v43 }
 0x585   : > { %v1514_v44 = vpop.eup %1513 }
 0x586   : > { %1460 = vpush %v1514_v44 }
 0x5b7   : > { %s1461_s25 = spop %1460 }
 0x5b8   : > { %v442_v45 = vstv %s1461_s25 }
 0x5b9   : > { %v443_v46 = vmul.f32 %v442_v45, %v423_v32 }
 0x5bb   : > { %1398 = vmatpush3.msra.mxu0 %v443_v46 }
 0x5bc   : > { %1400 = vmatmul.mubr.msk.f32.vlgmr.msra.gmra.mrb[2].mxu0 %vm247_vm2, %v443_v46  ;;  %1407 = vmatprep.subr.mxu0 %v1535_v1 }
 0x5bd   : > { %1409 = vmatprep.mubr.msk.f32.mxu0 %vm1536_vm1, %v1535_v1 }
 0x68f   : > { %v513_v47 = vpop.f32.mrb[2].mxu0 }
 0x690   : > { %v517_v48 = vand.u32 2147483647, %v513_v47  ;;  %v1401_v49 = vpop.f32.mrb[3].mxu0 }
 0x692   : > { %v518_v50 = vsel %vm247_vm2, %v517_v48, -inf }
 0x693   : > { %519 = vmax.xlane.f32.xlu1 %v518_v50 }
 0x720   : > { %v520_v51 = vpop.xlane.xlu1 %519 }
 0x721   : > { %v521_v52 = vrot.slane %v520_v51, 4 }
 0x723   : > { %v522_v53 = vmax.f32 %v520_v51, %v521_v52 }
 0x725   : > { %v523_v54 = vrot.slane %v522_v53, 2 }
 0x727   : > { %v524_v55 = vmax.f32 %v522_v53, %v523_v54 }
 0x729   : > { %v525_v56 = vrot.slane %v524_v55, 1 }
 0x72b   : > { %v526_v57 = vmax.f32 %v524_v55, %v525_v56 }
 0x72d   : > { %1462 = vpush %v526_v57 }
 0x75e   : > { %s1463_s26 = spop %1462 }
 0x75f   : > { %s528_s27 = smax.f32 %s1537_s17, %s1463_s26 }
 0x760   : > { %v529_v58 = vstv %s528_s27 }
 0x761   : > { %1515 = vrcp.f32 %v529_v58 }
 0x76b   : > { %v1516_v59 = vpop.eup %1515 }
 0x76c   : > { %1464 = vpush %v1516_v59  ;;  %v915_v59 = vcombine.low %v911_v34, %v911_v34 }
 0x79d   : > { %s1465_s28 = spop %1464 }
 0x79e   : > { %v532_v60 = vstv %s1465_s28 }
 0x79f   : > { %v533_v61 = vmul.f32 %v532_v60, %v513_v47 }
 0x7a1   : > { %1403 = vmatpush3.msra.mxu1 %v533_v61 }
 0x7a2   : > { %1405 = vmatmul.mubr.msk.f32.vlgmr.msra.gmra.mrb[4].mxu1 %vm247_vm2, %v533_v61  ;;  %1412 = vmatprep.subr.mxu1 %v1535_v1 }
 0x7a3   : > { %1414 = vmatprep.mubr.msk.f32.mxu1 %vm1536_vm1, %v1535_v1 }
 0x875   : > { %v603_v62 = vpop.f32.mrb[4].mxu1 }
 0x876   : > { %v607_v63 = vand.u32 2147483647, %v603_v62  ;;  %v1406_v3 = vpop.f32.mrb[5].mxu1 }
 0x878   : > { %v608_v4 = vsel %vm247_vm2, %v607_v63, -inf }
 0x879   : > { %609 = vmax.xlane.f32.xlu0 %v608_v4 }
 0x906   : > { %v610_v5 = vpop.xlane.xlu0 %609 }
 0x907   : > { %v611_v6 = vrot.slane %v610_v5, 4 }
 0x909   : > { %v612_v7 = vmax.f32 %v610_v5, %v611_v6 }
 0x90b   : > { %v613_v8 = vrot.slane %v612_v7, 2 }
 0x90d   : > { %v614_v9 = vmax.f32 %v612_v7, %v613_v8 }
 0x90f   : > { %v615_v10 = vrot.slane %v614_v9, 1 }
 0x911   : > { %v616_v11 = vmax.f32 %v614_v9, %v615_v10 }
 0x913   : > { %1466 = vpush %v616_v11 }
 0x944   : > { %s1467_s29 = spop %1466 }
 0x945   : > { %s618_s30 = smax.f32 %s1537_s17, %s1467_s29  ;;  %s1549_s29 = smov 1.0  }
 0x946   : > { %v619_v12 = vstv %s618_s30 }
 0x947   : > { %1517 = vrcp.f32 %v619_v12 }
 0x951   : > { %v1518_v13 = vpop.eup %1517 }
 0x952   : > { %1468 = vpush %v1518_v13  ;;  %v903_v13 = vld [vmem:[%s1648_s11 + $0x8] sm:$0xf] }
 0x953   : > { %909 = vst [vmem:[#allocation2 + $0x10] sm:$0xf] %v903_v13 }
 0x983   : > { %s1469_s4 = spop %1468 }
 0x984   : > { %v622_v14 = vstv %s1469_s4 }
 0x985   : > { %v623_v15 = vmul.f32 %v622_v14, %v603_v62 }
 0x987   : > { %1408 = vmatpush3.msra.mxu0 %v623_v15 }
 0x988   : > { %1410 = vmatmul.mubr.msk.f32.vlgmr.msra.gmra.mrb[4].mxu0 %vm247_vm2, %v623_v15  ;;  %1417 = vmatprep.subr.mxu0 %v1535_v1 }
 0x989   : > { %1419 = vmatprep.mubr.msk.f32.mxu0 %vm1536_vm1, %v1535_v1 }
 0xa5b   : > { %v693_v16 = vpop.f32.mrb[4].mxu0 }
 0xa5c   : > { %v697_v17 = vand.u32 2147483647, %v693_v16  ;;  %v1411_v18 = vpop.f32.mrb[5].mxu0 }
 0xa5d   : > { %v1546_v18 = vmov 0.0|0.0  }
 0xa5e   : > { %v698_v19 = vsel %vm247_vm2, %v697_v17, -inf }
 0xa5f   : > { %699 = vmax.xlane.f32.xlu1 %v698_v19 }
 0xa70   : > { %918 = vrot.lane.b32.xlu1 %v1651_v33, %s1538_s14 }
 0xaec   : > { %v700_v20 = vpop.xlane.xlu1 %699 }
 0xaed   : > { %v701_v21 = vrot.slane %v700_v20, 4 }
 0xaef   : > { %v702_v22 = vmax.f32 %v700_v20, %v701_v21 }
 0xaf0   : > { %v919_v60 = vpop.permute.xlu1 %918 }
 0xaf1   : > { %v703_v23 = vrot.slane %v702_v22, 2 }
 0xaf3   : > { %v704_v24 = vmax.f32 %v702_v22, %v703_v23 }
 0xaf5   : > { %v705_v25 = vrot.slane %v704_v24, 1 }
 0xaf7   : > { %v706_v26 = vmax.f32 %v704_v24, %v705_v25 }
 0xaf9   : > { %1470 = vpush %v706_v26 }
 0xb2a   : > { %s1471_s5 = spop %1470 }
 0xb2b   : > { %s708_s6 = smax.f32 %s1537_s17, %s1471_s5  ;;  %s1541_s17 = smov 103  }
 0xb2c   : > { %v709_v27 = vstv %s708_s6  ;;  %s1449_s5 = smul.u32 24, %s1741_s13 }
 0xb2d   : > { %1519 = vrcp.f32 %v709_v27 }
 0xb2e   : > { %s170_s8 = scalar_lea.vmem %s1739_s3, %s1449_s5 }
 0xb37   : > { %v1520_v28 = vpop.eup %1519 }
 0xb38   : > { %1472 = vpush %v1520_v28 }
 0xb69   : > { %s1473_s7 = spop %1472 }
 0xb6a   : > { %v712_v29 = vstv %s1473_s7 }
 0xb6b   : > { %v713_v30 = vmul.f32 %v712_v29, %v693_v16 }
 0xb6d   : > { %1413 = vmatpush3.msra.mxu1 %v713_v30 }
 0xb6e   : > { %1415 = vmatmul.mubr.msk.f32.vlgmr.msra.gmra.mrb[6].mxu1 %vm247_vm2, %v713_v30 }
 0xb6f   : > { %1200 = vmatprep.mubr.f32.mxu1 %v1535_v1 }
 0xc41   : > { %v783_v31 = vpop.f32.mrb[6].mxu1 }
 0xc42   : > { %v1416_v32 = vpop.f32.mrb[7].mxu1  ;;  %1418 = vmatpush3.msra.mxu0 %v783_v31  ;;  %v868_v37 = vmul.f32 %v783_v31, %v783_v31 }
 0xc43   : > { %1420 = vmatmul.mubr.msk.f32.vlgmr.msra.gmra.mrb[6].mxu0 %vm247_vm2, %v1596_v2  ;;  %v1657_v2 = vcombine.high %v1651_v33, %v1651_v33  ;;  %1443 = vmatprep.subr.bf16.mxu0 %v1546_v18 }
 0xc44   : > { %1432 = vmatprep.mubr.msk.f32.mxu0 %vm1536_vm1, %v1535_v1  ;;  %v869_v38 = vsel %vm247_vm2, %v868_v37, 0.0 }
 0xc45   : > { %908 = vst [vmem:[#allocation2 + $0x8] sm:$0xf] %v1657_v2  ;;  %942 = vrot.lane.b32.xlu1 %v1657_v2, %s1539_s15  ;;  %v870_v39 = vrot.slane %v869_v38, 4 }
 0xc47   : > { %v871_v40 = vadd.f32 %v870_v39, %v869_v38 }
 0xc49   : > { %944 = vrot.lane.b32.xlu1 %v911_v34, %s1539_s15  ;;  %v872_v41 = vrot.slane %v871_v40, 2 }
 0xc4b   : > { %v873_v42 = vadd.f32 %v872_v41, %v871_v40 }
 0xc4d   : > { %966 = vrot.lane.b32.xlu1 %v1651_v33, %s1540_s16  ;;  %v874_v43 = vrot.slane %v873_v42, 1 }
 0xc4f   : > { %v875_v44 = vadd.f32 %v874_v43, %v873_v42 }
 0xc51   : > { %916 = vrot.lane.b32.xlu1 %v914_v35, %s1538_s14  ;;  %v876_v46 = vmax.f32 %v875_v44, 1e-30 }
 0xc53   : > { %1521 = vrcp.f32 %v876_v46 }
 0xc55   : > { %964 = vrot.lane.b32.xlu1 %v914_v35, %s1540_s16 }
 0xc59   : > { %946 = vrot.lane.b32.xlu1 %v939_v36, %s1539_s15 }
 0xc5d   : > { %v1522_v56 = vpop.eup %1521  ;;  %990 = vrot.lane.b32.xlu1 %v1657_v2, %s1541_s17 }
 0xc61   : > { %1014 = vrot.lane.b32.xlu1 %v1651_v33, %s1542_s18 }
 0xc65   : > { %1038 = vrot.lane.b32.xlu1 %v1657_v2, %s1543_s19 }
 0xc69   : > { %1062 = vrot.lane.b32.xlu1 %v1651_v33, %s1544_s20 }
 0xc6d   : > { %988 = vrot.lane.b32.xlu1 %v1651_v33, %s1541_s17 }
 0xc71   : > { %1036 = vrot.lane.b32.xlu1 %v1651_v33, %s1543_s19 }
 0xc75   : > { %994 = vrot.lane.b32.xlu1 %v939_v36, %s1541_s17 }
 0xc79   : > { %1042 = vrot.lane.b32.xlu1 %v939_v36, %s1543_s19 }
 0xc7d   : > { %1086 = vrot.lane.b32.xlu1 %v1657_v2, %s1545_s21 }
 0xc81   : > { %1084 = vrot.lane.b32.xlu1 %v1651_v33, %s1545_s21 }
 0xcb7   : > { %v943_v61 = vpop.permute.xlu1 %942 }
 0xcbb   : > { %v945_v62 = vpop.permute.xlu1 %944 }
 0xcbc   : > { %v950_v63 = vsel %vm948_vm3, %v943_v61, %v945_v62 }
 0xcbd   : > { %956 = vst [vmem:[#allocation2 + $0x20] sm:$0xf] %v950_v63 }
 0xcbf   : > { %v967_v3 = vpop.permute.xlu1 %966 }
 0xcc3   : > { %v917_v4 = vpop.permute.xlu1 %916 }
 0xcc4   : > { %v925_v5 = vsel %vm924_vm4, %v917_v4, %v919_v60 }
 0xcc5   : > { %931 = vst [vmem:[#allocation2] sm:$0xf0] %v925_v5 }
 0xcc7   : > { %v965_v6 = vpop.permute.xlu1 %964 }
 0xcc8   : > { %v973_v7 = vsel %vm972_vm5, %v965_v6, %v967_v3 }
 0xcc9   : > { %979 = vst [vmem:[#allocation2 + $0x18] sm:$0xf0] %v973_v7 }
 0xccb   : > { %v947_v8 = vpop.permute.xlu1 %946 }
 0xccc   : > { %v951_v9 = vsel %vm948_vm3, %v945_v62, %v947_v8  ;;  %v1102_v32 = vld [vmem:[#allocation2] sm:$0xff] }
 0xccd   : > { %957 = vst [vmem:[#allocation2 + $0x28] sm:$0xf] %v951_v9 }
 0xccf   : > { %v991_v10 = vpop.permute.xlu1 %990 }
 0xcd3   : > { %v1693_v11 = vpop.permute.xlu1 %1014 }
 0xcd7   : > { %v1039_v12 = vpop.permute.xlu1 %1038 }
 0xcdb   : > { %v1696_v14 = vpop.permute.xlu1 %1062 }
 0xcdf   : > { %v989_v16 = vpop.permute.xlu1 %988 }
 0xce0   : > { %v997_v17 = vsel %vm996_vm6, %v989_v16, %v991_v10 }
 0xce1   : > { %1003 = vst [vmem:[#allocation2 + $0x30] sm:$0xf] %v997_v17 }
 0xce3   : > { %v1037_v20 = vpop.permute.xlu1 %1036 }
 0xce4   : > { %v1045_v22 = vsel %vm1044_vm7, %v1037_v20, %v1039_v12 }
 0xce5   : > { %1051 = vst [vmem:[#allocation2 + $0x48] sm:$0xf] %v1045_v22 }
 0xce7   : > { %v995_v37 = vpop.permute.xlu1 %994 }
 0xd16   : > { %v856_v45 = vpop.f32.mrb[6].mxu0 }
 0xd17   : > { %v860_v47 = vmul.f32 %v856_v45, %v783_v31  ;;  %v1421_v48 = vpop.f32.mrb[7].mxu0  ;;  %v1043_v45 = vpop.permute.xlu1 %1042 }
 0xd19   : > { %v861_v49 = vsel %vm247_vm2, %v860_v47, 0.0 }
 0xd1a   : > { %v862_v50 = vrot.slane %v861_v49, 4 }
 0xd1c   : > { %v863_v51 = vadd.f32 %v862_v50, %v861_v49 }
 0xd1e   : > { %v864_v52 = vrot.slane %v863_v51, 2 }
 0xd20   : > { %v865_v53 = vadd.f32 %v864_v52, %v863_v51  ;;  %v1087_v51 = vpop.permute.xlu1 %1086 }
 0xd22   : > { %v866_v54 = vrot.slane %v865_v53, 1 }
 0xd24   : > { %v867_v55 = vadd.f32 %v866_v54, %v865_v53 }
 0xd26   : > { %v878_v57 = vmul.f32 %v1522_v56, %v867_v55  ;;  %v1085_v55 = vpop.permute.xlu1 %1084 }
 0xd28   : > { %v879_v58 = vsel %vm247_vm2, %v878_v57, -inf  ;;  %v1093_v57 = vsel %vm1092_vm10, %v1085_v55, %v1087_v51 }
 0xd29   : > { %880 = vmax.xlane.f32.xlu0 %v879_v58  ;;  %1099 = vst [vmem:[#allocation2 + $0x60] sm:$0xf] %v1093_v57 }
 0xd3f   : > { %920 = vrot.lane.b32.xlu0 %v915_v59, %s1538_s14 }
 0xd43   : > { %968 = vrot.lane.b32.xlu0 %v915_v59, %s1540_s16 }
 0xd47   : > { %940 = vrot.lane.b32.xlu0 %v1651_v33, %s1539_s15 }
 0xd4b   : > { %922 = vrot.lane.b32.xlu0 %v911_v34, %s1538_s14 }
 0xd4f   : > { %970 = vrot.lane.b32.xlu0 %v911_v34, %s1540_s16 }
 0xd53   : > { %992 = vrot.lane.b32.xlu0 %v911_v34, %s1541_s17 }
 0xd57   : > { %1016 = vrot.lane.b32.xlu0 %v915_v59, %s1542_s18 }
 0xd5b   : > { %1040 = vrot.lane.b32.xlu0 %v911_v34, %s1543_s19 }
 0xd5f   : > { %1064 = vrot.lane.b32.xlu0 %v915_v59, %s1544_s20 }
 0xd63   : > { %1012 = vrot.lane.b32.xlu0 %v914_v35, %s1542_s18 }
 0xd67   : > { %1060 = vrot.lane.b32.xlu0 %v914_v35, %s1544_s20 }
 0xd6b   : > { %1018 = vrot.lane.b32.xlu0 %v911_v34, %s1542_s18 }
 0xd6f   : > { %1066 = vrot.lane.b32.xlu0 %v911_v34, %s1544_s20 }
 0xd73   : > { %1088 = vrot.lane.b32.xlu0 %v911_v34, %s1545_s21 }
 0xd77   : > { %1090 = vrot.lane.b32.xlu0 %v939_v36, %s1545_s21 }
 0xdb6   : > { %v881_v15 = vpop.xlane.xlu0 %880 }
 0xdb7   : > { %1474 = vpush %v881_v15 }
 0xdba   : > { %v921_v19 = vpop.permute.xlu0 %920 }
 0xdbb   : > { %v926_v21 = vsel %vm924_vm4, %v919_v60, %v921_v19 }
 0xdbc   : > { %932 = vst [vmem:[#allocation2 + $0x8] sm:$0xf0] %v926_v21 }
 0xdbe   : > { %v969_v23 = vpop.permute.xlu0 %968 }
 0xdbf   : > { %v974_v24 = vsel %vm972_vm5, %v967_v3, %v969_v23 }
 0xdc0   : > { %980 = vst [vmem:[#allocation2 + $0x20] sm:$0xf0] %v974_v24 }
 0xdc2   : > { %v941_v25 = vpop.permute.xlu0 %940 }
 0xdc3   : > { %v949_v26 = vsel %vm948_vm3, %v941_v25, %v943_v61  ;;  %v1103_v27 = vld [vmem:[#allocation2 + $0x8] sm:$0xff] }
 0xdc4   : > { %955 = vst [vmem:[#allocation2 + $0x18] sm:$0xf] %v949_v26 }
 0xdc6   : > { %v923_v28 = vpop.permute.xlu0 %922 }
 0xdc7   : > { %v927_v29 = vsel %vm924_vm4, %v921_v19, %v923_v28  ;;  %v1106_v30 = vld [vmem:[#allocation2 + $0x20] sm:$0xff] }
 0xdc8   : > { %933 = vst [vmem:[#allocation2 + $0x10] sm:$0xf0] %v927_v29  ;;  %v1435_v31 = vpack.c.bf16 %v1106_v30, %v1103_v27  ;;  %v1114_v19 = vld [vmem:[#allocation2 + $0x60] sm:$0xf] }
 0xdca   : > { %v971_v33 = vpop.permute.xlu0 %970  ;;  %1436 = vmatprep.subr.bf16.mxu1 %v1435_v31 }
 0xdcb   : > { %v975_v2 = vsel %vm972_vm5, %v969_v23, %v971_v33  ;;  %v1105_v34 = vld [vmem:[#allocation2 + $0x18] sm:$0xff] }
 0xdcc   : > { %981 = vst [vmem:[#allocation2 + $0x28] sm:$0xf0] %v975_v2  ;;  %v1437_v35 = vpack.c.bf16 %v1105_v34, %v1102_v32 }
 0xdce   : > { %v993_v36 = vpop.permute.xlu0 %992  ;;  %1438 = vmatpush1.bf16.msra.mxu1 %v1437_v35 }
 0xdcf   : > { %v998_v38 = vsel %vm996_vm6, %v991_v10, %v993_v36  ;;  %v999_v39 = vsel %vm996_vm6, %v993_v36, %v995_v37  ;;  %v1104_v40 = vld [vmem:[#allocation2 + $0x10] sm:$0xff]  ;;  %v1117_v10 = vld [vmem:[%s1738_s2] sm:$0xff] }
 0xdd0   : > { %1004 = vst [vmem:[#allocation2 + $0x38] sm:$0xf] %v998_v38  ;;  %1005 = vst [vmem:[#allocation2 + $0x40] sm:$0xf] %v999_v39 }
 0xdd2   : > { %v1017_v41 = vpop.permute.xlu0 %1016 }
 0xdd3   : > { %v1022_v42 = vsel %vm1020_vm8, %v1693_v11, %v1017_v41  ;;  %v1107_v43 = vld [vmem:[#allocation2 + $0x28] sm:$0xff] }
 0xdd4   : > { %1028 = vst [vmem:[#allocation2 + $0x38] sm:$0xf0] %v1022_v42  ;;  %v1444_v44 = vpack.c.bf16 %v1107_v43, %v1104_v40 }
 0xdd6   : > { %v1041_v46 = vpop.permute.xlu0 %1040  ;;  %1445 = vmatpush3.bf16.msra.mxu0 %v1444_v44 }
 0xdd7   : > { %v1046_v47 = vsel %vm1044_vm7, %v1039_v12, %v1041_v46  ;;  %v1047_v48 = vsel %vm1044_vm7, %v1041_v46, %v1043_v45  ;;  %1446 = vmatprep.subr.bf16.mxu0 %v1546_v18 }
 0xdd8   : > { %1052 = vst [vmem:[#allocation2 + $0x50] sm:$0xf] %v1046_v47  ;;  %1053 = vst [vmem:[#allocation2 + $0x58] sm:$0xf] %v1047_v48 }
 0xdda   : > { %v1065_v49 = vpop.permute.xlu0 %1064 }
 0xddb   : > { %v1070_v50 = vsel %vm1068_vm9, %v1696_v14, %v1065_v49  ;;  %v1109_v54 = vld [vmem:[#allocation2 + $0x38] sm:$0xff] }
 0xddc   : > { %1076 = vst [vmem:[#allocation2 + $0x50] sm:$0xf0] %v1070_v50 }
 0xdde   : > { %v1013_v52 = vpop.permute.xlu0 %1012 }
 0xddf   : > { %v1021_v53 = vsel %vm1020_vm8, %v1013_v52, %v1693_v11  ;;  %v1548_v11 = vmov 0  }
 0xde0   : > { %1027 = vst [vmem:[#allocation2 + $0x30] sm:$0xf0] %v1021_v53  ;;  %1503 = vset.pattern.permute.xlu1 %v1548_v11  ;;  %1504 = vset.pattern.permute.xlu0 %v1548_v11 }
 0xde1   : > { %1120 = vperm.xlu1 %1503, %v1117_v10  }
 0xde2   : > { %v1061_v56 = vpop.permute.xlu0 %1060 }
 0xde3   : > { %v1069_v58 = vsel %vm1068_vm9, %v1061_v56, %v1696_v14  ;;  %v1112_v59 = vld [vmem:[#allocation2 + $0x50] sm:$0xff] }
 0xde4   : > { %1075 = vst [vmem:[#allocation2 + $0x48] sm:$0xf0] %v1069_v58  ;;  %v1439_v60 = vpack.c.bf16 %v1112_v59, %v1109_v54 }
 0xde6   : > { %v1019_v61 = vpop.permute.xlu0 %1018  ;;  %1440 = vmatprep.subr.bf16.mxu1 %v1439_v60 }
 0xde7   : > { %v1023_v62 = vsel %vm1020_vm8, %v1017_v41, %v1019_v61  ;;  %v1108_v63 = vld [vmem:[#allocation2 + $0x30] sm:$0xff] }
 0xde8   : > { %s1475_s22 = spop %1474  ;;  %1029 = vst [vmem:[#allocation2 + $0x40] sm:$0xf0] %v1023_v62 }
 0xde9   : > { %s883_s24 = smax.f32 %s1547_s23, %s1475_s22 }
 0xdea   : > { %v884_v3 = vstv %s883_s24  ;;  %v1067_v4 = vpop.permute.xlu0 %1066 }
 0xdeb   : > { %1523 = vrsqrt.f32 %v884_v3  ;;  %v1111_v5 = vld [vmem:[#allocation2 + $0x48] sm:$0xff]  ;;  %v1071_v6 = vsel %vm1068_vm9, %v1065_v49, %v1067_v4  ;;  %vm887_vm12 = vcmp.eq.f32.partialorder %v884_v3, inf  ;;  %v890_v20 = vand.u32 2147483648, %v884_v3 }
 0xdec   : > { %v1441_v7 = vpack.c.bf16 %v1111_v5, %v1108_v63  ;;  %1077 = vst [vmem:[#allocation2 + $0x58] sm:$0xf0] %v1071_v6  ;;  %vm889_vm13 = vcmp.eq.f32.partialorder %v884_v3, 0.0 }
 0xdee   : > { %1442 = vmatpush1.bf16.msra.mxu1 %v1441_v7  ;;  %v1089_v8 = vpop.permute.xlu0 %1088 }
 0xdef   : > { %v1094_v9 = vsel %vm1092_vm10, %v1087_v51, %v1089_v8  ;;  %v1110_v12 = vld [vmem:[#allocation2 + $0x40] sm:$0xff] }
 0xdf0   : > { %1100 = vst [vmem:[#allocation2 + $0x68] sm:$0xf] %v1094_v9 }
 0xdf2   : > { %v1091_v13 = vpop.permute.xlu0 %1090 }
 0xdf3   : > { %v1095_v14 = vsel %vm1092_vm10, %v1089_v8, %v1091_v13  ;;  %v1113_v15 = vld [vmem:[#allocation2 + $0x58] sm:$0xff] }
 0xdf4   : > { %1101 = vst [vmem:[#allocation2 + $0x70] sm:$0xf] %v1095_v14  ;;  %v1447_v17 = vpack.c.bf16 %v1113_v15, %v1110_v12 }
 0xdf5   : > { %v1524_v16 = vpop.eup %1523 }
 0xdf6   : > { %v886_v18 = vmul.f32 %v1524_v16, %v884_v3  ;;  %1448 = vmatpush3.bf16.msra.mxu0 %v1447_v17 }
 0xdf7   : > { %v1115_v21 = vld [vmem:[#allocation2 + $0x68] sm:$0xf]  ;;  %1430 = vmatprep.subr.mxu0 %v1535_v1 }
 0xdf8   : > { %v888_v22 = vsel %vm887_vm12, %v884_v3, %v886_v18  ;;  %1352 = vmatprep.subr.msk.mxu1 %vm1126_vm11, %v1115_v21 }
 0xdf9   : > { %v891_v23 = vsel %vm889_vm13, %v890_v20, %v888_v22  ;;  %1353 = vmatpush1.msk.msra.mxu1 %vm1126_vm11, %v1114_v19 }
 0xdfa   : > { %1476 = vpush %v891_v23 }
 0xdfb   : > { %v1116_v24 = vld [vmem:[#allocation2 + $0x70] sm:$0xf] }
 0xdfc   : > { %1431 = vmatpush3.msk.msra.mxu0 %vm1126_vm11, %v1116_v24 }
 0xe2b   : > { %s1477_s27 = spop %1476 }
 0xe2c   : > { %s895_s28 = smul.f32 0.5, %s1477_s27 }
 0xe2e   : > { %s896_s30 = smax.f32 %s1549_s29, %s895_s28 }
 0xe2f   : > { %v897_v25 = vstv %s896_s30 }
 0xe30   : > { %1525 = vrcp.f32 %v897_v25 }
 0xe3a   : > { %v1526_v26 = vpop.eup %1525 }
 0xe3b   : > { %1478 = vpush %v1526_v26 }
 0xe60   : > { %v1121_v1 = vpop.permute.xlu1 %1120 }
 0xe6c   : > { %s1479_s4 = spop %1478 }
 0xe6d   : > { %v900_v27 = vstv %s1479_s4 }
 0xe6e   : > { %v901_v28 = vmul.f32 %v900_v27, %v1581_v0 }
 0xe70   : > { %1354 = vmatmul.mubr.msk.f32.vlgmr.msra.gmra.mrb[8].mxu1 %vm172_vm0, %v901_v28  ;;  %1433 = vmatmul.mubr.msk.f32.vlgmr.msra.gmra.mrb[8].mxu0 %vm172_vm0, %v901_v28 }
 0xf43   : > { %v1202_v29 = vpop.f32.mrb[8].mxu1  ;;  %v1273_v30 = vpop.f32.mrb[8].mxu0 }
 0xf44   : > { %v1203_v31 = vadd.f32 %v1202_v29, %v1121_v1  ;;  %v1274_v32 = vadd.f32 %v1273_v30, %v1121_v1  ;;  %v1204_v33 = vpop.f32.mrb[9].mxu1  ;;  %v1434_v2 = vpop.f32.mrb[9].mxu0 }
 0xf45   : > { %v1205_v34 = vadd.f32 %v1204_v33, %v1121_v1 }
 0xf46   : > { %1277 = vst [vmem:[%s170_s8] sm:$0xff] %v1203_v31  ;;  %1279 = vst [vmem:[%s170_s8 + $0x10] sm:$0xff] %v1274_v32 }
 0xf47   : > { %1278 = vst [vmem:[%s170_s8 + $0x8] sm:$0xff] %v1205_v34 }
 0xf48 PF: > { %s13_s12 = sadd.s32 1, %s1533_s12  }
 0xf49   : > { %p10_p4 = scmp.ge.s32.totalorder %s13_s12, 4  }
 0xf4b   :  { %12 = sbr.rel (!%p10_p4) target bundleno = 1 (0x1), region = 62 }

</bundles_post_ra>
